<compile_context>
chip_gen: v6e
topology: v6e:2x2x1
jax: 0.10.0
libtpu: 0.0.40
codegen_flags: <defaults>
</compile_context>

<pallas_src>
import math

import jax
import jax.numpy as jnp
from jax.experimental import pallas as pl
from jax.experimental.pallas import tpu as pltpu


_VMEM_LIMIT_BYTES = 32 * 1024 * 1024   # scoped VMEM limit handed to Mosaic
_VMEM_BUDGET_BYTES = 24 * 1024 * 1024  # tile-selection budget (headroom below the limit)


# ----------------------------------------------------------------------------
# Fused DataEmbedding kernel
# ----------------------------------------------------------------------------
def _data_embedding_kernel(xc_ref, w_ref, pe_ref, o_ref):
    """Per grid step (n, b):

      xc_ref : (tb, L, K)  bf16  concatenated [x[t-1] | x[t] | x[t+1] | x_mark]
      w_ref  : (K, tn)     bf16  concatenated [conv tap0 | tap1 | tap2 | timeF W]
      pe_ref : (L, tn)     f32   positional-embedding tile
      o_ref  : (tb, L, tn)       output tile
    """
    w = w_ref[...]
    pe = pe_ref[...]
    # Static unroll over the (small) batch tile: one MXU matmul per row,
    # f32 accumulation, positional add + (optional) downcast in the epilogue.
    for i in range(o_ref.shape[0]):
        acc = jnp.dot(xc_ref[i], w, preferred_element_type=jnp.float32)
        o_ref[i] = (acc + pe).astype(o_ref.dtype)


# ----------------------------------------------------------------------------
# Tile selection (lane-dense, VMEM-budget aware)
# ----------------------------------------------------------------------------
def _round_up(x, m):
    return (x + m - 1) // m * m


def _pick_tn(d_model_p, L, K, out_bytes, budget):
    """Largest 128-multiple output tile that fits the per-step VMEM budget."""
    for tn in (512, 256, 128):
        if d_model_p % tn != 0:
            continue
        # double-buffered pe + out + operands, plus one f32 accumulator's worth.
        fp = 2 * (L * tn * 4 + L * tn * out_bytes + K * tn * 2 + L * K * 2) \
            + L * tn * 4
        if fp <= budget:
            return tn
    return 128  # d_model_p is always a multiple of 128 after padding


def _pick_tb(B, L, K, tn, nd, out_bytes, budget):
    """Largest batch tile that (a) divides B, (b) fits the VMEM budget and
    (c) keeps >= 2 parallel grid iterations when the d_model axis degenerates
    to a single tile (so v7x's two TensorCores both get work)."""
    want_multi = (nd == 1 and B > 1)
    for tb in range(B, 0, -1):
        if B % tb != 0:
            continue
        if want_multi and B // tb < 2:
            continue
        fp = 2 * (tb * L * K * 2 + K * tn * 2 + L * tn * 4
                  + tb * L * tn * out_bytes) + tb * L * tn * 4
        if fp <= budget:
            return tb
    return 1


# ----------------------------------------------------------------------------
# Wrapper
# ----------------------------------------------------------------------------
def data_embedding(params, x, x_mark=None, out_dtype=jnp.float32):
    """Fused DataEmbedding forward.

    x      : (B, L, c_in)  float
    x_mark : (B, L, d_inp) float time features (timeF path), or None
    out_dtype: keep jnp.float32 for exact module semantics; pass jnp.bfloat16
               to halve the dominant HBM write stream if downstream is bf16.
    """
    B, L, c_in = x.shape
    token_w = params["token_w"]                  # (3, c_in, d_model), tap k ~ x[t+k-1]
    timef_w = params["timef_w"]                  # (d_inp, d_model)
    d_model = token_w.shape[-1]
    d_inp = timef_w.shape[0]
    pe = params["pe"][:L].astype(jnp.float32)    # (L, d_model)

    if x_mark is None:
        # Reference forward allows x_mark=None; a Linear of zeros contributes 0.
        x_mark = jnp.zeros((B, L, d_inp), x.dtype)

    # ---- wrapper-side operand prep (tiny vs. the (B, L, d_model) output) ----
    # Circular Conv1d(k=3) folded into one GEMM: concatenate the three shifted
    # copies of x with the time features along the contraction axis, in bf16.
    x_b = x.astype(jnp.bfloat16)
    x_cat = jnp.concatenate(
        [jnp.roll(x_b, 1, axis=1),               # x[t-1]  (circular)
         x_b,                                    # x[t]
         jnp.roll(x_b, -1, axis=1),              # x[t+1]  (circular)
         x_mark.astype(jnp.bfloat16)],
        axis=-1)                                 # (B, L, K) bf16
    K = x_cat.shape[-1]                          # 3*c_in + d_inp

    w_cat = jnp.concatenate(
        [token_w[0], token_w[1], token_w[2], timef_w], axis=0
    ).astype(jnp.bfloat16)                       # (K, d_model) bf16

    # Lane-dense output: pad d_model up to a multiple of 128 (zero columns),
    # slice back after the kernel.  Avoids masked vst.msk partial stores.
    d_model_p = _round_up(d_model, 128)
    if d_model_p != d_model:
        w_cat = jnp.pad(w_cat, ((0, 0), (0, d_model_p - d_model)))
        pe = jnp.pad(pe, ((0, 0), (0, d_model_p - d_model)))

    out_bytes = jnp.dtype(out_dtype).itemsize
    tn = _pick_tn(d_model_p, L, K, out_bytes, _VMEM_BUDGET_BYTES)
    nd = d_model_p // tn
    tb = _pick_tb(B, L, K, tn, nd, out_bytes, _VMEM_BUDGET_BYTES)
    nb = B // tb

    # d_model tiles OUTER, batch INNER (fastest): w_cat / pe block indices are
    # constant across the inner axis, so they are fetched once per n-tile
    # instead of once per (n, b) pair.
    grid = (nd, nb)

    flops = 2 * B * L * K * d_model_p
    bytes_accessed = (x_cat.size * 2 + w_cat.size * 2 + pe.size * 4
                      + B * L * d_model_p * out_bytes)

    out = pl.pallas_call(
        _data_embedding_kernel,
        out_shape=jax.ShapeDtypeStruct((B, L, d_model_p), out_dtype),
        grid_spec=pltpu.PrefetchScalarGridSpec(
            num_scalar_prefetch=0,
            grid=grid,
            in_specs=[
                pl.BlockSpec((tb, L, K), lambda n, b: (b, 0, 0)),
                pl.BlockSpec((K, tn), lambda n, b: (0, n)),
                pl.BlockSpec((L, tn), lambda n, b: (0, n)),
            ],
            out_specs=pl.BlockSpec((tb, L, tn), lambda n, b: (b, 0, n)),
        ),
        compiler_params=pltpu.CompilerParams(
            dimension_semantics=("parallel", "parallel"),
            vmem_limit_bytes=_VMEM_LIMIT_BYTES,
        ),
        cost_estimate=pl.CostEstimate(
            flops=flops, transcendentals=0, bytes_accessed=bytes_accessed
        ),
    )(x_cat, w_cat, pe)

    if d_model_p != d_model:
        out = out[..., :d_model]

    # TODO(synk): nn.Dropout(p=0.1) is stochastic; treated as eval-mode identity.
    return out


# ----------------------------------------------------------------------------
# Deterministic parameter initialization (shapes follow the PyTorch __init__)
# ----------------------------------------------------------------------------
def init_params(key, c_in, d_model, d_inp=4, max_len=5000):
    k_tok, k_tf = jax.random.split(key, 2)

    # TokenEmbedding Conv1d weight, PyTorch layout (d_model, c_in, 3),
    # kaiming_normal_(mode='fan_in', nonlinearity='leaky_relu').
    std = math.sqrt(2.0 / (1.0 + 0.01 ** 2) / (c_in * 3))
    w_conv = std * jax.random.normal(k_tok, (d_model, c_in, 3), jnp.float32)
    # Reorder to (tap, c_in, d_model): tap k contracts x[t + k - 1] (circular).
    token_w = jnp.transpose(w_conv, (2, 1, 0))

    # TimeFeatureEmbedding Linear(d_inp -> d_model, bias=False), stored (in, out).
    bound = 1.0 / math.sqrt(d_inp)
    timef_w = jax.random.uniform(k_tf, (d_inp, d_model), jnp.float32, -bound, bound)

    # PositionalEmbedding: fixed sin/cos table (max_len, d_model).
    pos = jnp.arange(max_len, dtype=jnp.float32)[:, None]
    div = jnp.exp(jnp.arange(0, d_model, 2, dtype=jnp.float32)
                  * (-(math.log(10000.0) / d_model)))
    pe = jnp.zeros((max_len, d_model), jnp.float32)
    pe = pe.at[:, 0::2].set(jnp.sin(pos * div))
    pe = pe.at[:, 1::2].set(jnp.cos(pos * div))

    # TODO(synk): embed_type='fixed' (TemporalEmbedding with integer-indexed
    # FixedEmbedding tables) is a gather; this implements the embed_type='timeF'
    # configuration of DataEmbedding.
    return {"token_w": token_w, "timef_w": timef_w, "pe": pe}


# Pure-JAX f32 reference used only for an in-script sanity check.
def data_embedding_reference(params, x, x_mark):
    L = x.shape[1]
    wtok = params["token_w"]
    val = (jnp.einsum("btc,cd->btd", jnp.roll(x, 1, axis=1), wtok[0])
           + jnp.einsum("btc,cd->btd", x, wtok[1])
           + jnp.einsum("btc,cd->btd", jnp.roll(x, -1, axis=1), wtok[2]))
    tmp = jnp.einsum("btc,cd->btd", x_mark, params["timef_w"])
    return val + tmp + params["pe"][:L][None]


# ----------------------------------------------------------------------------
if __name__ == "__main__":
    B, L, c_in, d_model, d_inp = 2, 32, 7, 128, 4   # freq='h' -> 4 time features
    key = jax.random.PRNGKey(0)
    kx, km, kp = jax.random.split(key, 3)
    x = jax.random.normal(kx, (B, L, c_in), jnp.float32)
    x_mark = jax.random.normal(km, (B, L, d_inp), jnp.float32)
    params = init_params(kp, c_in, d_model, d_inp=d_inp, max_len=5000)

    fwd = jax.jit(data_embedding)
    out = jax.block_until_ready(fwd(params, x, x_mark))

    assert out.shape == (B, L, d_model), out.shape
    assert bool(jnp.all(jnp.isfinite(out)))

    ref = data_embedding_reference(params, x, x_mark)
    max_err = float(jnp.max(jnp.abs(out - ref)))
    assert max_err < 5e-2, f"max abs error vs f32 reference: {max_err}"

    print("KERNEL_OK")
</pallas_src>

<mosaic_0001>
module attributes {stable_mosaic.version = 11 : i64} {
  func.func @_data_embedding_kernel(%arg0: i32, %arg1: i32, %arg2: memref<1x32x25xbf16, #tpu.memory_space<vmem>>, %arg3: memref<25x128xbf16, #tpu.memory_space<vmem>>, %arg4: memref<32x128xf32, #tpu.memory_space<vmem>>, %arg5: memref<1x32x128xf32, #tpu.memory_space<vmem>>) attributes {dimension_semantics = [#tpu.dimension_semantics<parallel>, #tpu.dimension_semantics<parallel>], iteration_bounds = array<i64: 1, 2>, scalar_prefetch = 0 : i64, scratch_operands = 0 : i64, tpu.core_type = #tpu.core_type<tc>, window_params = [{transform_indices = @transform_0, window_bounds = array<i64: 1, 32, 25>}, {transform_indices = @transform_1, window_bounds = array<i64: 25, 128>}, {transform_indices = @transform_2, window_bounds = array<i64: 32, 128>}, {transform_indices = @transform_3, window_bounds = array<i64: 1, 32, 128>}]} {
    %c0 = arith.constant 0 : index
    %c0_0 = arith.constant 0 : index
    %0 = vector.load %arg3[%c0, %c0_0] : memref<25x128xbf16, #tpu.memory_space<vmem>>, vector<25x128xbf16>
    %c0_1 = arith.constant 0 : index
    %c0_2 = arith.constant 0 : index
    %1 = vector.load %arg4[%c0_1, %c0_2] : memref<32x128xf32, #tpu.memory_space<vmem>>, vector<32x128xf32>
    %c0_3 = arith.constant 0 : index
    %c0_4 = arith.constant 0 : index
    %c0_5 = arith.constant 0 : index
    %2 = vector.load %arg2[%c0_3, %c0_4, %c0_5] : memref<1x32x25xbf16, #tpu.memory_space<vmem>>, vector<1x32x25xbf16>
    %3 = vector.shape_cast %2 : vector<1x32x25xbf16> to vector<32x25xbf16>
    %cst = arith.constant dense<0.000000e+00> : vector<32x128xf32>
    %4 = tpu.matmul %3, %0, %cst {dimension_numbers = #tpu.dot_dimension_numbers<[1], [0], [0], [1], [0, 0, 1, 1], [], []>} : vector<32x25xbf16>, vector<25x128xbf16>, vector<32x128xf32> -> vector<32x128xf32>
    %5 = arith.addf %4, %1 : vector<32x128xf32>
    %c0_6 = arith.constant 0 : index
    %c0_7 = arith.constant 0 : index
    %c0_8 = arith.constant 0 : index
    %6 = vector.load %arg5[%c0_6, %c0_7, %c0_8] : memref<1x32x128xf32, #tpu.memory_space<vmem>>, vector<1x32x128xf32>
    %7 = vector.shape_cast %6 : vector<1x32x128xf32> to vector<32x128xf32>
    %8 = vector.shape_cast %5 : vector<32x128xf32> to vector<1x32x128xf32>
    tpu.vector_store %arg5[%c0_6, %c0_7, %c0_8], %8 {strides = array<i32>} : memref<1x32x128xf32, #tpu.memory_space<vmem>>, vector<1x32x128xf32>,
    return
  }
  func.func @transform_0(%arg0: i32, %arg1: i32) -> (i32, i32, i32) {
    %c0_i32 = arith.constant 0 : i32
    %c0_i32_0 = arith.constant 0 : i32
    %c0_i32_1 = arith.constant 0 : i32
    return %arg1, %c0_i32, %c0_i32_0 : i32, i32, i32
  }
  func.func @transform_1(%arg0: i32, %arg1: i32) -> (i32, i32) {
    %c0_i32 = arith.constant 0 : i32
    %c0_i32_0 = arith.constant 0 : i32
    return %c0_i32, %arg0 : i32, i32
  }
  func.func @transform_2(%arg0: i32, %arg1: i32) -> (i32, i32) {
    %c0_i32 = arith.constant 0 : i32
    %c0_i32_0 = arith.constant 0 : i32
    return %c0_i32, %arg0 : i32, i32
  }
  func.func @transform_3(%arg0: i32, %arg1: i32) -> (i32, i32, i32) {
    %c0_i32 = arith.constant 0 : i32
    %c0_i32_0 = arith.constant 0 : i32
    return %arg1, %c0_i32, %arg0 : i32, i32, i32
  }
}

</mosaic_0001>

<bundles_post_ra>
// kernel: data_embedding.1
= control target key start
LH: loop header
LB: loop body
LE: loop exit
PB: predicated region body
PF: predicated region fallthrough
CT: control target
= control target key end

     0   :  { %8 = vsyncpa [#allocation3], 0  ;;  %s766_s0 = inlined_call_operand.vmem [shape: bf16[2,32,25], index: 0, kind: input, shape index: {}]   ;;  %s767_s1 = inlined_call_operand.vmem [shape: bf16[25,128], index: 1, kind: input, shape index: {}]   ;;  %s768_s2 = inlined_call_operand.vmem [shape: f32[32,128], index: 2, kind: input, shape index: {}]   ;;  %s769_s3 = inlined_call_operand.hbm [shape: f32[2,32,128], index: 3, kind: output, shape index: {}]  }
   0x1   :  { %10 = vsyncpa [#allocation3 + $0x1], 0  ;;  %s634_s12 = smov 0   ;;  %s636_s13 = smov 0  }
   0x2   :  { %s638_s14 = smov 0   ;;  %s640_s15 = smov 0  }
   0x3   :  { %s642_s16 = smov 0   ;;  %s644_s17 = smov 0  }
   0x4 LB: > { %s435_s18 = sadd.s32 4294967295, %s608_s17   ;;  %s436_s19 = sadd.s32 4294967294, %s608_s17   ;;  %s608_s17 = sphi %s644_s17, %s16_s17   ;;  %s604_s16 = sphi %s642_s16, %s776_s16   ;;  %s600_s15 = sphi %s640_s15, %s775_s15   ;;  %s596_s14 = sphi %s638_s14, %s774_s14   ;;  %s592_s13 = sphi %s636_s13, %s773_s13   ;;  %s588_s12 = sphi %s634_s12, %s772_s12  }
   0x5   : > { %s25_s20 = sadd.s32 1, %s604_s16  ;;  %s115_s21 = sadd.s32 1, %s596_s14 }
   0x6   : > { %p26_p0 = scmp.ge.s32.totalorder %s25_s20, 2  ;;  %p125_p1 = scmp.ne.s32.totalorder %s596_s14, %s592_s13 }
   0x7   : > { %p126_p2 = scmp.eq.s32.totalorder %s435_s18, 1  ;;  %p131_p3 = scmp.ne.s32.totalorder %s592_s13, %s588_s12 }
   0x8   : > { %s778_s20 = smov (%p26_p0, %s25_s20), 0  ;;  %p132_p5 = scmp.eq.s32.totalorder %s436_s19, 1 }
   0x9   : > { %p674_p4 = por %p126_p2, %p125_p1  ;;  %s110_s23 = ssub.s32 %s604_s16, %s778_s20 }
   0xa   : > { %p441_p6 = scmp.ge.s32.totalorder %s608_s17, 1  ;;  %p113_p7 = scmp.eq.s32.totalorder %s110_s23, 0 }
   0xb   : > { %p681_p8 = por %p132_p5, %p131_p3  ;;  %p172_p9 = scmp.lt.s32.totalorder %s608_s17, 3 }
   0xc   : > { %s687_s25 = scalar_select %p113_p7, %s596_s14, %s115_s21  }
   0xd   : > { %p173_p10 = pnand %p441_p6, %p172_p9 }
   0xe   : > { %p204_p11 = scmp.lt.s32.totalorder (!%p173_p10), %s600_s15, 1  ;;  %s201_s8 = sand.u32 (!%p173_p10), 1, %s592_s13  }
   0xf   : > { %176 = sbr.rel (%p173_p10) target bundleno = 248 (0xf8), region = 32  ;;  %s442_s9 = sshll.u32 (!%p173_p10), %s201_s8, 5 }
  0x10   : > { %s203_s26 = scalar_lea.vmem (!%p173_p10), [#allocation2], %s442_s9  ;;  %s457_s28 = sshll.u32 (!%p173_p10), %s600_s15, 9 }
  0x11   : > { %s333_s27 = sshll.u32 (!%p173_p10), %s203_s26, 4  ;;  %s719_s6 = scalar_lea.hbm (!%p173_p10), %s769_s3, %s457_s28  ;;  %s714_s27 = int_to_ptr.vmem [resolvable:$true] %s333_s27 }
  0x12   : > { %s611_s9 = smov (!%p173_p10), [#allocation2]  }
  0x13   : > { %s536_s10 = sshll.u32 (!%p173_p10), %s611_s9, 4  ;;  %s537_s10 = int_to_ptr.vmem [resolvable:$false] %s536_s10 }
  0x14   : > { %v528_v0 = vld [vmem:[%s767_s1 + $0x8] sm:$0x1f]   ;;  %vm258_vm0 = vcmask 1043456   ;;  %vm259_vm1 = vcmask 1044480   ;;  %v610_v1 = vmov 65535   ;;  %v529_v5 = vld [vmem:[%s767_s1] sm:$0xff]   ;;  %p539_p1 = scmp.lt.s32.totalorder %s714_s27, %s537_s10 }
  0x15   : > { %v260_v2 = vsel %vm258_vm0, 4294967295, %v610_v1  ;;  %s205_s30 = scalar_select %p204_p11, %s600_s15, 1  ;;  %vm251_vm2 = vcmask 203776   ;;  %v224_v8 = vld [vmem:[%s768_s2 + $0x10] sm:$0xff]  ;;  %v222_v10 = vld [vmem:[%s768_s2] sm:$0xff]  ;;  %v225_v13 = vld [vmem:[%s768_s2 + $0x18] sm:$0xff] }
  0x16   : > { %v261_v3 = vsel %vm259_vm1, %v260_v2, 0  ;;  %v223_v16 = vld [vmem:[%s768_s2 + $0x8] sm:$0xff]  ;;  %s721_s15 = scalar_lea.sflag [#allocation3], %s201_s8  ;;  %s538_s11 = scalar_lea.vmem %s537_s10, 1024 }
  0x17   : > { %v263_v4 = vand.u32 %v528_v0, %v261_v3  ;;  %s456_s4 = sshll.u32 %s205_s30, 4 }
  0x18   : > { %s208_s7 = scalar_lea.vmem %s766_s0, %s456_s4 }
  0x19   : > { %462 = vmatprep.subr.bf16.mxu0 %v263_v4  ;;  %v530_v6 = vld [vmem:[%s208_s7] sm:$0xff]   ;;  %v531_v7 = vld [vmem:[%s208_s7 + $0x8] sm:$0xff]   ;;  %s532_s7 = scalar_lea.vmem %s714_s27, 512 }
  0x1a   : > { %463 = vmatpush3.bf16.msra.mxu0 %v263_v4  ;;  %466 = vmatprep.mubr.msk.bf16.mxu0 %vm251_vm2, %v530_v6  ;;  %p533_p12 = scmp.ne.s32.totalorder %s714_s27, %s532_s7  ;;  %p540_p2 = scmp.lt.s32.totalorder %s538_s11, %s532_s7 }
  0x1b   : > { %464 = vmatprep.subr.bf16.mxu0 %v529_v5 }
  0x1c   : > { %p534_p13 = pnand %p533_p12, %p674_p4  ;;  %p541_p3 = por %p540_p2, %p539_p1 }
  0x1e   : > { %465 = vmatpush3.bf16.msra.mxu0 %v529_v5  ;;  %p535_p0 = pneg %p534_p13 }
  0x20   : > { %p542_p5 = pnand %p541_p3, %p535_p0 }
  0x21   : > { %467 = vmatmul.mubr.msk.bf16.vlgmr.msra.gmra.mxu0 %vm251_vm2, %v531_v7 }
  0xe1   : > { %v468_v9 = vpop.f32.mrf.mxu0 }
  0xe2   : > { %v308_v11 = vadd.f32 %v468_v9, %v224_v8 }
  0xe3   : > { %v299_v12 = vpop.f32.mrf.mxu0 }
  0xe4   : > { %316 = vst [vmem:[%s203_s26 + $0x10] sm:$0xff] %v308_v11  ;;  %v300_v14 = vadd.f32 %v299_v12, %v222_v10 }
  0xe5   : > { %v469_v15 = vpop.f32.mrf.mxu0 }
  0xe6   : > { %314 = vst [vmem:[%s203_s26] sm:$0xff] %v300_v14  ;;  %v311_v17 = vadd.f32 %v469_v15, %v225_v13 }
  0xe7   : > { %v302_v18 = vpop.f32.mrf.mxu0 }
  0xe8   : > { %317 = vst [vmem:[%s203_s26 + $0x18] sm:$0xff] %v311_v17  ;;  %v303_v19 = vadd.f32 %v302_v18, %v223_v16 }
  0xea   : > { %315 = vst [vmem:[%s203_s26 + $0x8] sm:$0xff] %v303_v19 }
  0xeb   : > { %545 = shalt.err (!%p542_p5)
}
  0xec   : > { %s546_s8 = scalar_lea.hbm %s719_s6, 512  ;;  %s550_s21 = scalar_lea.hbm %s769_s3, 1024 }
  0xed   : > { %p547_p6 = scmp.ne.s32.totalorder %s719_s6, %s546_s8  ;;  %p551_p10 = scmp.lt.s32.totalorder %s719_s6, %s769_s3 }
  0xee   : > { %p552_p11 = scmp.lt.s32.totalorder %s550_s21, %s546_s8 }
  0xef   : > { %p548_p7 = pnand %p547_p6, %p674_p4 }
  0xf0   : > { %p553_p12 = por %p552_p11, %p551_p10 }
  0xf1   : > { %p549_p9 = pneg %p548_p7 }
  0xf3   : > { %p554_p13 = pnand %p553_p12, %p549_p9 }
  0xf5   : > { %557 = shalt.err (!%p554_p13)
}
  0xf6   : > { %s612_s28 = smov 128   ;;  %s613_s29 = smov 8  }
  0xf7   : > { %470 = dma.vmem_to_hbm [thread:$0]  (%p674_p4), %s714_s27, 512, %s719_s6, %s721_s15, %s612_s28, %s612_s28, %s613_s29  }
  0xf8 PF: > { %p476_p0 = scmp.ge.s32.totalorder %s608_s17, 2  ;;  %s348_s30 = sand.u32 1, %s588_s12  }
  0xf9   : > { %s349_s4 = scalar_lea.sflag [#allocation3], %s348_s30 }
  0xfa   : > { %p473_p1 = pnand %p476_p0, %p681_p8 }
  0xfc   : > { %p474_p2 = pneg %p473_p1 }
  0xfe   : > { %583 = dma.done.wait (%p474_p2), %s349_s4, 512  }
  0xff   : > { %585 = vsyncadd (%p474_p2), %s349_s4, 4294966784  ;;  %s16_s17 = sadd.s32 1, %s608_s17   ;;  %s772_s12 = smov %s592_s13 }
 0x100   : > { %p13_p3 = scmp.ge.s32.totalorder %s16_s17, 4   ;;  %s773_s13 = smov %s596_s14 }
 0x101   : > { %s774_s14 = smov %s687_s25  ;;  %s775_s15 = smov %s604_s16 }
 0x102   : > { %s776_s16 = smov %s778_s20  ;;  %15 = sbr.rel (!%p13_p3) target bundleno = 4 (0x4), region = 73 }
 0x107   :  { %354 = vsyncpa [#allocation3], 1 }
 0x108   :  { %356 = vsyncpa [#allocation3 + $0x1], 1 }

</bundles_post_ra>
